<compile_context>
chip_gen: v7x
topology: tpu7x:2x2x1
jax: 0.10.0
libtpu: 0.0.40
codegen_flags: <defaults>
</compile_context>

<pallas_src>
import functools

import jax
import jax.numpy as jnp
from jax.experimental import pallas as pl
from jax.experimental.pallas import tpu as pltpu

_LANE = 128
_MB = 1024 * 1024


def _eca_fused_kernel(w_ref, x_ref, o_ref, pooled_ref, *, k_size, inv_hw):
    """One batch element: global avg-pool, k-tap channel conv, sigmoid, scale.

    w_ref      : (k,)            f32, SMEM  -- Conv1d(1,1,k) taps
    x_ref/o_ref: (C, HW)         VMEM       -- channels on sublanes, spatial on lanes
    pooled_ref : (C + 2*pad, 1)  f32, VMEM  -- zero-padded pooled channel vector
    """
    C = x_ref.shape[0]
    pad = (k_size - 1) // 2

    # Global average pool: lane-axis reduction with f32 accumulation.  The block
    # is the *logical* (unpadded) HW; Mosaic masks the non-128 lane tail, and
    # inv_hw is the static reciprocal of the logical spatial size.
    pooled_ref[...] = jnp.zeros_like(pooled_ref)
    pooled_ref[pl.ds(pad, C), :] = (
        jnp.sum(x_ref[...], axis=1, keepdims=True, dtype=jnp.float32) * inv_hw
    )

    # "Same"-padded cross-correlation over the channel axis as k shifted adds:
    # conv[c] = sum_j w[j] * pooled[c + j - pad]  (zeros outside [0, C)),
    # implemented as k static sublane-offset reads of the zero-padded scratch.
    conv = jnp.zeros((C, 1), jnp.float32)
    for j in range(k_size):
        conv = conv + w_ref[j] * pooled_ref[pl.ds(j, C), :]

    # Gate in the activation dtype so the dominant broadcast multiply runs at
    # native (bf16) width on v6e/v7x; neutral for f32 inputs / v5e.
    gate = jax.nn.sigmoid(conv).astype(o_ref.dtype)            # (C, 1)
    o_ref[...] = (x_ref[...] * gate).astype(o_ref.dtype)       # re-read x per use


def _eca_scale_kernel(g_ref, x_ref, o_ref):
    """Fallback: apply a precomputed per-channel gate to one (C, hw_tile) block."""
    o_ref[...] = (x_ref[...] * g_ref[...]).astype(o_ref.dtype)


def _vmem_capacity_bytes():
    try:
        return int(pltpu.get_tpu_info().vmem_capacity_bytes)
    except Exception:
        return 64 * _MB  # v7x per-core VMEM; conservative for all current gens


def _round_up(x, m):
    return -(-x // m) * m


def eca_forward(x, weight, k_size=3, *, force_hw_tiled=False, donate_x=False):
    """x: (N, C, H, W), weight: (k,) (Conv1d(1,1,k,bias=False) taps)."""
    N, C, H, W = x.shape
    HW = H * W
    pad = (k_size - 1) // 2
    w = weight.reshape(-1).astype(jnp.float32)            # (k,)
    itemsize = jnp.dtype(x.dtype).itemsize

    # No HBM pad / slice: pass the logical (N, C, HW) view, full-extent blocks.
    x2 = x.reshape(N, C, HW)

    vmem_cap = _vmem_capacity_bytes()
    vmem_budget = int(0.9 * vmem_cap)

    # Physical VMEM footprint of one (C, HW) slab (sublane/lane tiling padded).
    sub = max(8, 32 // itemsize)                           # f32: 8, bf16: 16
    slab = _round_up(C, sub) * _round_up(HW, _LANE) * itemsize
    fixed = _round_up(C + 2 * pad, 8) * _LANE * 4 + 2 * _MB  # pooled scratch + internal

    # Pick the cheapest pipelining mode whose resident buffers fit VMEM:
    #   default        : 2 in + 2 out slabs (full overlap)
    #   Buffered(1) out: 2 in + 1 out
    #   Buffered(1) all: 1 in + 1 out (no overlap, but still 1R+1W HBM traffic,
    #                    better than the fallback's 1.5x traffic)
    plans = (
        (4 * slab + fixed, None, None),
        (3 * slab + fixed, None, pl.Buffered(1)),
        (2 * slab + fixed, pl.Buffered(1), pl.Buffered(1)),
    )
    plan = next((p for p in plans if p[0] <= vmem_budget), None)

    aliases = {1: 0} if donate_x else {}   # x2 is input #1 in both paths

    if plan is not None and not force_hw_tiled:
        needed, in_mode, out_mode = plan

        def slab_spec(mode):
            kw = {} if mode is None else {"pipeline_mode": mode}
            return pl.BlockSpec((None, C, HW), lambda b: (b, 0, 0), **kw)

        kernel = functools.partial(
            _eca_fused_kernel, k_size=k_size, inv_hw=1.0 / float(HW)
        )
        out = pl.pallas_call(
            kernel,
            out_shape=jax.ShapeDtypeStruct((N, C, HW), x.dtype),
            grid_spec=pltpu.PrefetchScalarGridSpec(
                num_scalar_prefetch=0,
                grid=(N,),
                in_specs=[
                    # (k,) conv taps live in SMEM (scalar reads, no VMEM traffic)
                    pl.BlockSpec(memory_space=pltpu.MemorySpace.SMEM),
                    slab_spec(in_mode),
                ],
                out_specs=slab_spec(out_mode),
                scratch_shapes=[pltpu.VMEM((C + 2 * pad, 1), jnp.float32)],
            ),
            input_output_aliases=aliases,
            compiler_params=pltpu.CompilerParams(
                dimension_semantics=("parallel",),
                vmem_limit_bytes=int(min(needed + 8 * _MB, vmem_budget)),
            ),
        )(w, x2)
    else:
        # ---- fallback for slabs that don't fit VMEM ----
        # Gate via a cheap XLA reduce + tiny conv (one extra read of x), then a
        # pure HW-tiled broadcast multiply with a fully parallel 2-D grid.
        pooled = jnp.mean(x2, axis=2, dtype=jnp.float32)                # (N, C)
        padded = jnp.pad(pooled, ((0, 0), (pad, pad)))                  # (N, C+2p)
        conv = sum(w[j] * padded[:, j:j + C] for j in range(k_size))    # (N, C)
        gate = jax.nn.sigmoid(conv)[:, :, None].astype(x.dtype)         # (N, C, 1)

        # Large lane-dense blocks: ~1/7 of usable VMEM per block (4 blocks
        # resident with double buffering) -> ~8 MiB on v7x, ~16 MiB on 128 MiB parts.
        tile_budget = max(4 * _MB, vmem_budget // 7)
        hw_tile = (tile_budget // (_round_up(C, sub) * itemsize)) // _LANE * _LANE
        hw_tile = int(max(_LANE, hw_tile))
        if hw_tile >= HW:
            hw_tile = HW            # single full-extent block (legal even if HW < 128)
        n_tiles = pl.cdiv(HW, hw_tile)

        blk = _round_up(C, sub) * _round_up(hw_tile, _LANE) * itemsize
        needed = 4 * blk + 4 * _round_up(C, sub) * _LANE * itemsize + 2 * _MB

        out = pl.pallas_call(
            _eca_scale_kernel,
            out_shape=jax.ShapeDtypeStruct((N, C, HW), x.dtype),
            grid_spec=pltpu.PrefetchScalarGridSpec(
                num_scalar_prefetch=0,
                grid=(N, n_tiles),
                in_specs=[
                    pl.BlockSpec((None, C, 1), lambda b, t: (b, 0, 0)),
                    pl.BlockSpec((None, C, hw_tile), lambda b, t: (b, 0, t)),
                ],
                out_specs=pl.BlockSpec((None, C, hw_tile), lambda b, t: (b, 0, t)),
            ),
            input_output_aliases=aliases,
            compiler_params=pltpu.CompilerParams(
                dimension_semantics=("parallel", "parallel"),
                vmem_limit_bytes=int(min(needed + 8 * _MB, vmem_budget)),
            ),
        )(gate, x2)

    return out.reshape(N, C, H, W)


def eca_reference(x, weight, k_size=3):
    """Pure-JAX reference mirroring the PyTorch module."""
    pad = (k_size - 1) // 2
    w = weight.reshape(-1).astype(jnp.float32)
    pooled = x.mean(axis=(2, 3))                               # (N, C)
    padded = jnp.pad(pooled, ((0, 0), (pad, pad)))             # (N, C + 2*pad)
    conv = sum(w[j] * padded[:, j:j + pooled.shape[1]] for j in range(k_size))
    gate = jax.nn.sigmoid(conv)[:, :, None, None]              # (N, C, 1, 1)
    return x * gate


if __name__ == "__main__":
    key = jax.random.PRNGKey(0)
    kx, kw = jax.random.split(key)

    N, C, H, W, K = 2, 4, 16, 16, 3
    x = jax.random.normal(kx, (N, C, H, W), dtype=jnp.float32)
    # Deterministic stand-in for Conv1d(1, 1, 3, bias=False).weight ((1,1,3) -> (3,))
    weight = jax.random.normal(kw, (K,), dtype=jnp.float32) * 0.5

    ref = eca_reference(x, weight, k_size=K)

    # 1) Fused single-pass path (f32, HW a multiple of 128).
    out = jax.block_until_ready(eca_forward(x, weight, k_size=K))
    assert out.shape == x.shape
    assert jnp.allclose(out, ref, atol=1e-5, rtol=1e-5), "fused path mismatch"

    # 2) Fused path with a non-128-multiple spatial size (masked lane tail, no pad).
    x_odd = jax.random.normal(kx, (N, C, 15, 15), dtype=jnp.float32)
    ref_odd = eca_reference(x_odd, weight, k_size=K)
    out_odd = jax.block_until_ready(eca_forward(x_odd, weight, k_size=K))
    assert jnp.allclose(out_odd, ref_odd, atol=1e-5, rtol=1e-5), "odd-HW fused mismatch"

    # 3) HW-tiled fallback path (what very large feature maps would take).
    out_tiled = jax.block_until_ready(
        eca_forward(x, weight, k_size=K, force_hw_tiled=True)
    )
    assert jnp.allclose(out_tiled, ref, atol=1e-5, rtol=1e-5), "tiled path mismatch"

    # 4) bf16 activations: gating multiply stays in bf16 (looser tolerance).
    x_bf = x.astype(jnp.bfloat16)
    ref_bf = eca_reference(x_bf.astype(jnp.float32), weight, k_size=K)
    out_bf = jax.block_until_ready(eca_forward(x_bf, weight, k_size=K))
    assert out_bf.dtype == jnp.bfloat16
    assert jnp.allclose(out_bf.astype(jnp.float32), ref_bf, atol=3e-2, rtol=3e-2), \
        "bf16 fused mismatch"

    print("KERNEL_OK")
</pallas_src>

<mosaic_0001>
module attributes {stable_mosaic.version = 11 : i64} {
  func.func @_eca_fused_kernel(%arg0: i32, %arg1: memref<3xf32, #tpu.memory_space<smem>>, %arg2: memref<1x4x256xf32, #tpu.memory_space<vmem>>, %arg3: memref<1x4x256xf32, #tpu.memory_space<vmem>>, %arg4: memref<6x1xf32, #tpu.memory_space<vmem>>) attributes {dimension_semantics = [#tpu.dimension_semantics<parallel>], iteration_bounds = array<i64: 2>, scalar_prefetch = 0 : i64, scratch_operands = 1 : i64, tpu.core_type = #tpu.core_type<tc>, window_params = [{transform_indices = @transform_0, window_bounds = array<i64: 3>}, {transform_indices = @transform_1, window_bounds = array<i64: 1, 4, 256>}, {transform_indices = @transform_2, window_bounds = array<i64: 1, 4, 256>}]} {
    %cst = arith.constant 0.000000e+00 : f32
    %0 = vector.broadcast %cst : f32 to vector<6x1xf32>
    %c0 = arith.constant 0 : index
    %c0_0 = arith.constant 0 : index
    %1 = vector.load %arg4[%c0, %c0_0] : memref<6x1xf32, #tpu.memory_space<vmem>>, vector<6x1xf32>
    tpu.vector_store %arg4[%c0, %c0_0], %0 {strides = array<i32>} : memref<6x1xf32, #tpu.memory_space<vmem>>, vector<6x1xf32>,
    %c0_1 = arith.constant 0 : index
    %c0_2 = arith.constant 0 : index
    %c0_3 = arith.constant 0 : index
    %2 = vector.load %arg2[%c0_1, %c0_2, %c0_3] : memref<1x4x256xf32, #tpu.memory_space<vmem>>, vector<1x4x256xf32>
    %3 = vector.shape_cast %2 : vector<1x4x256xf32> to vector<4x256xf32>
    %cst_4 = arith.constant dense<0.000000e+00> : vector<4xf32>
    %4 = vector.multi_reduction <add>, %3, %cst_4 [1] : vector<4x256xf32> to vector<4xf32>
    %5 = vector.shape_cast %4 : vector<4xf32> to vector<4x1xf32>
    %cst_5 = arith.constant 3.906250e-03 : f32
    %6 = vector.broadcast %cst_5 : f32 to vector<4x1xf32>
    %7 = arith.mulf %5, %6 : vector<4x1xf32>
    %c1 = arith.constant 1 : index
    %c0_6 = arith.constant 0 : index
    %8 = vector.load %arg4[%c1, %c0_6] : memref<6x1xf32, #tpu.memory_space<vmem>>, vector<4x1xf32>
    tpu.vector_store %arg4[%c1, %c0_6], %7 {strides = array<i32>} : memref<6x1xf32, #tpu.memory_space<vmem>>, vector<4x1xf32>,
    %cst_7 = arith.constant 0.000000e+00 : f32
    %9 = vector.broadcast %cst_7 : f32 to vector<4x1xf32>
    %c0_8 = arith.constant 0 : index
    %10 = memref.load %arg1[%c0_8] : memref<3xf32, #tpu.memory_space<smem>>
    %c0_9 = arith.constant 0 : index
    %c0_10 = arith.constant 0 : index
    %11 = vector.load %arg4[%c0_9, %c0_10] : memref<6x1xf32, #tpu.memory_space<vmem>>, vector<4x1xf32>
    %12 = vector.broadcast %10 : f32 to vector<4x1xf32>
    %13 = arith.mulf %12, %11 : vector<4x1xf32>
    %14 = arith.addf %9, %13 : vector<4x1xf32>
    %c1_11 = arith.constant 1 : index
    %15 = memref.load %arg1[%c1_11] : memref<3xf32, #tpu.memory_space<smem>>
    %c1_12 = arith.constant 1 : index
    %c0_13 = arith.constant 0 : index
    %16 = vector.load %arg4[%c1_12, %c0_13] : memref<6x1xf32, #tpu.memory_space<vmem>>, vector<4x1xf32>
    %17 = vector.broadcast %15 : f32 to vector<4x1xf32>
    %18 = arith.mulf %17, %16 : vector<4x1xf32>
    %19 = arith.addf %14, %18 : vector<4x1xf32>
    %c2 = arith.constant 2 : index
    %20 = memref.load %arg1[%c2] : memref<3xf32, #tpu.memory_space<smem>>
    %c2_14 = arith.constant 2 : index
    %c0_15 = arith.constant 0 : index
    %21 = vector.load %arg4[%c2_14, %c0_15] : memref<6x1xf32, #tpu.memory_space<vmem>>, vector<4x1xf32>
    %22 = vector.broadcast %20 : f32 to vector<4x1xf32>
    %23 = arith.mulf %22, %21 : vector<4x1xf32>
    %24 = arith.addf %19, %23 : vector<4x1xf32>
    %25 = arith.negf %24 : vector<4x1xf32>
    %26 = math.exp %25 : vector<4x1xf32>
    %cst_16 = arith.constant 1.000000e+00 : f32
    %27 = vector.broadcast %cst_16 : f32 to vector<4x1xf32>
    %28 = arith.addf %27, %26 : vector<4x1xf32>
    %29 = arith.divf %27, %28 : vector<4x1xf32>
    %c0_17 = arith.constant 0 : index
    %c0_18 = arith.constant 0 : index
    %c0_19 = arith.constant 0 : index
    %30 = vector.load %arg2[%c0_17, %c0_18, %c0_19] : memref<1x4x256xf32, #tpu.memory_space<vmem>>, vector<1x4x256xf32>
    %31 = vector.shape_cast %30 : vector<1x4x256xf32> to vector<4x256xf32>
    %32 = vector.broadcast %29 : vector<4x1xf32> to vector<4x256xf32>
    %33 = arith.mulf %31, %32 : vector<4x256xf32>
    %c0_20 = arith.constant 0 : index
    %c0_21 = arith.constant 0 : index
    %c0_22 = arith.constant 0 : index
    %34 = vector.load %arg3[%c0_20, %c0_21, %c0_22] : memref<1x4x256xf32, #tpu.memory_space<vmem>>, vector<1x4x256xf32>
    %35 = vector.shape_cast %34 : vector<1x4x256xf32> to vector<4x256xf32>
    %36 = vector.shape_cast %33 : vector<4x256xf32> to vector<1x4x256xf32>
    tpu.vector_store %arg3[%c0_20, %c0_21, %c0_22], %36 {strides = array<i32>} : memref<1x4x256xf32, #tpu.memory_space<vmem>>, vector<1x4x256xf32>,
    return
  }
  func.func @transform_0(%arg0: i32) -> i32 {
    %c0_i32 = arith.constant 0 : i32
    %c0_i32_0 = arith.constant 0 : i32
    return %c0_i32 : i32
  }
  func.func @transform_1(%arg0: i32) -> (i32, i32, i32) {
    %c0_i32 = arith.constant 0 : i32
    %c0_i32_0 = arith.constant 0 : i32
    %c0_i32_1 = arith.constant 0 : i32
    return %arg0, %c0_i32, %c0_i32_0 : i32, i32, i32
  }
  func.func @transform_2(%arg0: i32) -> (i32, i32, i32) {
    %c0_i32 = arith.constant 0 : i32
    %c0_i32_0 = arith.constant 0 : i32
    %c0_i32_1 = arith.constant 0 : i32
    return %arg0, %c0_i32, %c0_i32_0 : i32, i32, i32
  }
}

</mosaic_0001>

<bundles_post_ra>
// kernel: tpu_custom_call.1
= control target key start
LH: loop header
LB: loop body
LE: loop exit
PB: predicated region body
PF: predicated region fallthrough
CT: control target
= control target key end

     0   :  { %7 = vsyncpa [#allocation6], 0  ;;  %s752_s0 = inlined_call_operand.hbm [shape: f32[3], index: 0, kind: input, shape index: {}]   ;;  %s753_s1 = inlined_call_operand.hbm [shape: f32[2,4,256], index: 1, kind: input, shape index: {}]   ;;  %s754_s2 = inlined_call_operand.hbm [shape: f32[2,4,256], index: 2, kind: output, shape index: {}]  }
   0x1   :  { %8 = vsyncpa [#allocation4], 0 }
   0x2   :  { %10 = vsyncpa [#allocation4 + $0x1], 0 }
   0x3   :  { %11 = vsyncpa [#allocation5], 0 }
   0x4   :  { %13 = vsyncpa [#allocation5 + $0x1], 0  ;;  %s543_s9 = smov 0   ;;  %s545_s10 = smov 0  }
   0x5   :  { %s547_s11 = smov 0   ;;  %s549_s12 = smov 0  }
   0x6 LB: > { %s564_s13 = sadd.s32 4294967295, %s520_s12   ;;  %s320_s14 = sadd.s32 4294967294, %s520_s12   ;;  %s520_s12 = sphi %s549_s12, %s775_s12   ;;  %s516_s11 = sphi %s547_s11, %s774_s11   ;;  %s512_s10 = sphi %s545_s10, %s773_s10   ;;  %s508_s9 = sphi %s543_s9, %s772_s9  }
   0x7   : > { %p60_p0 = scmp.ne.s32.totalorder %s512_s10, %s508_s9  ;;  %p755_p1 = scmp.eq.s32.totalorder %s564_s13, 0 }
   0x8   : > { %p90_p3 = scmp.eq.s32.totalorder %s320_s14, 1  ;;  %p321_p5 = scmp.ge.s32.totalorder %s520_s12, 1 }
   0x9   : > { %p573_p4 = por %p755_p1, %p60_p0  ;;  %p97_p7 = scmp.lt.s32.totalorder %s520_s12, 3 }
   0xa   : > { %p578_p6 = por %p90_p3, %p60_p0  ;;  %s589_s18 = sadd.s32 1, %s520_s12  }
   0xb   : > { %s758_s15 = scalar_select %p573_p4, 1, 0 }
   0xc   : > { %s759_s16 = scalar_select %p578_p6, 1, 0 }
   0xd   : > { %p583_p8 = pnand %p321_p5, %p97_p7  ;;  %s44_s19 = ssub.s32 %s520_s12, %s589_s18 }
   0xe   : > { %s47_s20 = sadd.s32 1, %s516_s11  ;;  %p602_p12 = scmp.eq.s32.totalorder %s44_s19, 0 }
   0xf   : > { %p349_p10 = pneg %p583_p8  ;;  %p54_p13 = scmp.ne.s32.totalorder %s516_s11, %s512_s10 }
  0x10   : > { %p55_p0 = scmp.eq.s32.totalorder %s520_s12, 0  ;;  %p362_p3 = scmp.lt.s32.totalorder %s520_s12, 2 }
  0x11   : > { %p598_p11 = pnand %p349_p10, %p755_p1  ;;  %s407_s25 = scalar_lea.hbm %s752_s0, 16 }
  0x12   : > { %p408_p5 = scmp.ne.s32.totalorder %s752_s0, %s407_s25  ;;  %p414_p1 = scmp.lt.u32.totalorder %s407_s25, %s752_s0 }
  0x13   : > { %p409_p7 = pneg %p598_p11 }
  0x15   : > { %p410_p10 = pnand %p409_p7, %p408_p5 }
  0x17   : > { %p411_p9 = pneg %p410_p10 }
  0x19   : > { %p416_p2 = pnand %p414_p1, %p411_p9 }
  0x1b   : > { %419 = shalt.err (!%p416_p2)
}
  0x1c   : > { %s522_s30 = smov [#allocation3]   ;;  %p56_p1 = por %p55_p0, %p54_p13 }
  0x1d   : > { %352 = dma.hbm_to_smem (!%p598_p11), %s752_s0, 16, %s522_s30, [#allocation6]  }
  0x1e   : > { %s629_s5 = scalar_select %p602_p12, %s516_s11, %s47_s20  }
  0x1f   : > { %p763_p2 = scmp.eq.s32.totalorder %s564_s13, 1  ;;  %s119_s7 = sand.u32 1, %s516_s11  }
  0x20   : > { %s339_s8 = sshll.u32 %s520_s12, 7  ;;  %s324_s14 = sshll.u32 %s119_s7, 3 }
  0x21   : > { %p641_p9 = por %p763_p2, %p54_p13  ;;  %s650_s23 = scalar_lea.hbm %s753_s1, %s339_s8 }
  0x22   : > { %s123_s20 = scalar_lea.vmem [#allocation7], %s324_s14  ;;  %p654_p11 = pnand %p362_p3, %p56_p1 }
  0x23   : > { %s764_s6 = scalar_select %p641_p9, 1, 0 }
  0x24   : > { %s131_s22 = sshll.u32 %s123_s20, 4  ;;  %s120_s25 = scalar_lea.sflag [#allocation4], %s119_s7  ;;  %s658_s22 = int_to_ptr.vmem [resolvable:$true] %s131_s22 }
  0x25   : > { %s420_s26 = scalar_lea.hbm %s650_s23, 128  ;;  %p422_p13 = pneg %p654_p11 }
  0x26   : > { %p421_p12 = scmp.ne.s32.totalorder %s650_s23, %s420_s26  ;;  %s425_s29 = scalar_lea.hbm %s753_s1, 256 }
  0x27   : > { %p426_p3 = scmp.lt.u32.totalorder %s650_s23, %s753_s1  ;;  %p427_p7 = scmp.lt.u32.totalorder %s425_s29, %s420_s26 }
  0x28   : > { %p423_p0 = pnand %p422_p13, %p421_p12  ;;  %p429_p1 = scmp.lt.u32.totalorder %s420_s26, %s650_s23 }
  0x29   : > { %p428_p10 = por %p427_p7, %p426_p3 }
  0x2a   : > { %p424_p5 = pneg %p423_p0 }
  0x2b   : > { %p430_p2 = por %p429_p1, %p428_p10 }
  0x2d   : > { %p431_p6 = pnand %p430_p2, %p424_p5 }
  0x2f   : > { %434 = shalt.err (!%p431_p6)
}
  0x30   : > { %s435_s4 = scalar_lea.vmem %s658_s22, 128  ;;  %s523_s7 = smov [#allocation7]  }
  0x31   : > { %p436_p12 = scmp.ne.s32.totalorder %s658_s22, %s435_s4  ;;  %s440_s8 = sshll.u32 %s523_s7, 4  ;;  %s441_s8 = int_to_ptr.vmem [resolvable:$false] %s440_s8 }
  0x32   : > { %s442_s14 = scalar_lea.vmem %s441_s8, 256  ;;  %p443_p4 = scmp.lt.s32.totalorder %s658_s22, %s441_s8 }
  0x33   : > { %p438_p0 = pnand %p436_p12, %p422_p13  ;;  %p444_p3 = scmp.lt.s32.totalorder %s442_s14, %s435_s4 }
  0x35   : > { %p439_p9 = pneg %p438_p0  ;;  %p445_p7 = por %p444_p3, %p443_p4 }
  0x37   : > { %p446_p10 = pnand %p445_p7, %p439_p9 }
  0x39   : > { %449 = shalt.err (!%p446_p10)
}
  0x3a   : > { %356 = dma.hbm_to_vmem [thread:$0]  (!%p654_p11), %s650_s23, 128, %s658_s22, %s120_s25  }
  0x3b   : > { %140 = sbr.rel (%p583_p8) target bundleno = 410 (0x19a), region = 28  ;;  %p766_p6 = scmp.eq.s32.totalorder (!%p583_p8), %s564_s13, 0 }
  0x42   : > { %495 = dma.done.wait (%p766_p6), [#allocation6], 16   ;;  %p767_p13 = pmov %p766_p6 }
  0x43   : > { %s692_s19 = sand.u32 1, %s512_s10   ;;  %p768_p4 = scmp.ne.s32.totalorder %s758_s15, 0 }
  0x44   : > { %497 = vsyncadd (%p767_p13), [#allocation6], 4294967280  ;;  %s329_s21 = sshll.u32 %s692_s19, 3  ;;  %s147_s20 = scalar_lea.sflag [#allocation4], %s692_s19 }
  0x45   : > { %s150_s23 = scalar_lea.vmem [#allocation7], %s329_s21 }
  0x46   : > { %499 = dma.done.wait (%p768_p4), %s147_s20, 128  }
  0x47   : > { %501 = vsyncadd (%p768_p4), %s147_s20, 4294967168 }
  0x48   : > { %155 = sfence }
  0x49   : > { %v174_v0 = vld [vmem:[%s150_s23] sm:$0xff]  ;;  %vm178_vm0 = vcmask 1043456   ;;  %vm172_vm1 = vcmask 5120   ;;  %v524_v5 = vmov 0.0   ;;  %v525_v6 = vmov 0   ;;  %s187_s17 = sld [smem:[#allocation3]] }
  0x4a   : > { %v176_v1 = vcombine.high %v174_v0, %v174_v0  ;;  %v179_v2 = vsel %vm178_vm0, %v174_v0, 0.0  ;;  %173 = vst.msk [vmem:[#allocation2] sm:$0x3f] %vm172_vm1, %v524_v5  ;;  %401 = vset.pattern.permute.xlu0 %v525_v6  ;;  %vm185_vm2 = vcmask 3072   ;;  %s331_s22 = sld [smem:[#allocation3 + $0x1]]  ;;  %s332_s15 = sld [smem:[#allocation3 + $0x2]]  ;;  %v216_v26 = vlaneseq }
  0x4b   : > { %v526_v24 = vmov 839922192   ;;  %s340_s24 = sshll.u32 %s564_s13, 7  ;;  %s171_s25 = scalar_lea.vmem [#allocation8], %s329_s21 }
  0x4c   : > { %v180_v3 = vsel %vm178_vm0, %v176_v1, 0.0  ;;  %v214_v25 = vunpack.c.l.s4 %v526_v24  ;;  %v217_v28 = vshrl.u32 %v216_v26, 7  ;;  %s238_s26 = sshll.u32 %s171_s25, 4  ;;  %s708_s29 = scalar_lea.hbm %s754_s2, %s340_s24  ;;  %s710_s26 = int_to_ptr.vmem [resolvable:$true] %s238_s26 }
  0x4d   : > { %v181_v4 = vadd.f32 %v180_v3, %v179_v2  ;;  %s224_s30 = scalar_lea.sflag [#allocation5], %s692_s19  ;;  %s450_s3 = scalar_lea.vmem %s710_s26, 128 }
  0x4e   : > { %v215_v27 = vunpack.c.0.s8 %v214_v25  ;;  %p451_p8 = scmp.ne.s32.totalorder %s710_s26, %s450_s3  ;;  %p769_p9 = scmp.ne.s32.totalorder %s764_s6, 0 }
  0x4f   : > { %182 = vadd.xlane.f32.xlu0 %v181_v4  ;;  %v189_v9 = vstv %s187_s17  ;;  %s527_s13 = smov [#allocation8]  }
  0x50   : > { %v194_v10 = vstv %s331_s22  ;;  %v199_v14 = vstv %s332_s15  ;;  %v218_v29 = vsub.s32 %v215_v27, %v217_v28  ;;  %p452_p11 = pnand %p451_p8, %p769_p9  ;;  %s454_s4 = sshll.u32 %s527_s13, 4  ;;  %s455_s4 = int_to_ptr.vmem [resolvable:$false] %s454_s4 }
  0x51   : > { %s456_s7 = scalar_lea.vmem %s455_s4, 256  ;;  %p457_p1 = scmp.lt.s32.totalorder %s710_s26, %s455_s4 }
  0x52   : > { %p453_p5 = pneg %p452_p11  ;;  %p458_p2 = scmp.lt.s32.totalorder %s456_s7, %s450_s3 }
  0x54   : > { %p459_p12 = por %p458_p2, %p457_p1 }
  0x56   : > { %p460_p0 = pnand %p459_p12, %p453_p5 }
  0xdc   : > { %v183_v7 = vpop.xlane.xlu0 %182 }
  0xdd   : > { %v184_v8 = vmul.f32 0.00390625, %v183_v7 }
  0xdf   : > { %186 = vst.msk [vmem:[#allocation2 + $0x1] sm:$0xf] %vm185_vm2, %v184_v8 }
  0xe6   : > { %v188_v11 = vld [vmem:[#allocation2] sm:$0xf] }
  0xe7   : > { %v193_v12 = vld [vmem:[#allocation2 + $0x1] sm:$0xf]  ;;  %v190_v15 = vmul.f32 %v189_v9, %v188_v11 }
  0xe8   : > { %v198_v13 = vld [vmem:[#allocation2 + $0x2] sm:$0xf]  ;;  %v195_v16 = vmul.f32 %v194_v10, %v193_v12 }
  0xe9   : > { %v200_v18 = vmul.f32 %v199_v14, %v198_v13 }
  0xea   : > { %v196_v17 = vadd.f32 %v195_v16, %v190_v15 }
  0xec   : > { %v201_v19 = vadd.f32 %v200_v18, %v196_v17 }
  0xee   : > { %v333_v20 = vmul.f32 -1.442695, %v201_v19 }
  0xf0   : > { %403 = vpow2.f32 %v333_v20 }
  0xfa   : > { %v404_v21 = vpop.eup %403 }
  0xfb   : > { %v205_v22 = vadd.f32 1.0, %v404_v21 }
  0xfd   : > { %405 = vrcp.f32 %v205_v22 }
 0x107   : > { %v406_v23 = vpop.eup %405 }
 0x108   : > { %211 = vperm.xlu0 %401, %v406_v23  }
 0x187   : > { %v212_v30 = vpop.permute.xlu0 %211 }
 0x188   : > { %v219_v31 = vrot.slane %v212_v30, %v218_v29 }
 0x18a   : > { %v221_v32 = vmul.f32 %v219_v31, %v174_v0 }
 0x18c   : > { %222 = vst [vmem:[%s171_s25] sm:$0xff] %v221_v32 }
 0x18d   : > { %463 = shalt.err (!%p460_p0)
}
 0x18e   : > { %s464_s8 = scalar_lea.hbm %s708_s29, 128  ;;  %s468_s21 = scalar_lea.hbm %s754_s2, 256 }
 0x18f   : > { %p465_p3 = scmp.ne.s32.totalorder %s708_s29, %s464_s8  ;;  %p469_p6 = scmp.lt.u32.totalorder %s708_s29, %s754_s2 }
 0x190   : > { %p470_p13 = scmp.lt.u32.totalorder %s468_s21, %s464_s8  ;;  %p472_p8 = scmp.lt.u32.totalorder %s464_s8, %s708_s29 }
 0x191   : > { %p466_p7 = pnand %p465_p3, %p769_p9 }
 0x192   : > { %p471_p4 = por %p470_p13, %p469_p6 }
 0x193   : > { %p467_p10 = pneg %p466_p7 }
 0x194   : > { %p473_p11 = por %p472_p8, %p471_p4 }
 0x196   : > { %p474_p5 = pnand %p473_p11, %p467_p10 }
 0x198   : > { %477 = shalt.err (!%p474_p5)
}
 0x199   : > { %347 = dma.vmem_to_hbm [thread:$0]  (%p769_p9), %s710_s26, 128, %s708_s29, %s224_s30  }
 0x19a PF: > { %s250_s17 = sand.u32 1, %s508_s9   ;;  %p770_p1 = scmp.ne.s32.totalorder %s759_s16, 0 }
 0x19b   : > { %p771_p2 = scmp.ge.s32.totalorder %s520_s12, 2  ;;  %s251_s22 = scalar_lea.sflag [#allocation5], %s250_s17 }
 0x19d   : > { %p358_p12 = pnand %p771_p2, %p770_p1 }
 0x19f   : > { %503 = dma.done.wait (!%p358_p12), %s251_s22, 128  }
 0x1a0   : > { %505 = vsyncadd (!%p358_p12), %s251_s22, 4294967168  ;;  %p16_p0 = scmp.ge.s32.totalorder %s589_s18, 4   ;;  %s772_s9 = smov %s512_s10 }
 0x1a1   : > { %s773_s10 = smov %s516_s11  ;;  %s774_s11 = smov %s629_s5 }
 0x1a2   : > { %s775_s12 = smov %s589_s18  ;;  %18 = sbr.rel (!%p16_p0) target bundleno = 6 (0x6), region = 78 }
 0x1a9   :  { %256 = vsyncpa [#allocation4], 1 }
 0x1aa   :  { %258 = vsyncpa [#allocation4 + $0x1], 1 }
 0x1ab   :  { %259 = vsyncpa [#allocation5], 1 }
 0x1ac   :  { %261 = vsyncpa [#allocation5 + $0x1], 1 }
 0x1ad   :  { %262 = vsyncpa [#allocation6], 1 }
 0x1ae   :  { %264 = vsyncpa [#allocation6 + $0x1], 1 }

</bundles_post_ra>
